<compile_context>
chip_gen: v5e
topology: v5e:2x2
jax: 0.10.0
libtpu: 0.0.40
codegen_flags: <defaults>
</compile_context>

<pallas_src>
import functools
from typing import NamedTuple

import jax
import jax.numpy as jnp
from jax.experimental import pallas as pl
from jax.experimental.pallas import tpu as pltpu


def _round_up(n, m):
    return (n + m - 1) // m * m


@functools.lru_cache(maxsize=1)
def _vmem_capacity_bytes():
    """Per-core VMEM capacity; conservative 64 MiB fallback (v7x) if unknown."""
    try:
        cap = int(pltpu.get_tpu_info().vmem_capacity_bytes)
        if cap > 0:
            return cap
    except Exception:
        pass
    return 64 << 20


@functools.lru_cache(maxsize=1)
def _single_buffer_supported():
    """One-time tiny probe: does this jax build accept pipeline_mode=pl.Buffered(1)?

    The probe is so small that any failure can only come from the Buffered(1)
    feature itself (not VMEM pressure), so it cannot poison the mode the way a
    shape-dependent OOM could.
    """
    try:
        def k(x_ref, w_ref, o_ref):
            o_ref[...] = x_ref[...] + w_ref[...]

        probe = pl.pallas_call(
            k,
            out_shape=jax.ShapeDtypeStruct((16, 128), jnp.float32),
            grid_spec=pltpu.PrefetchScalarGridSpec(
                num_scalar_prefetch=0,
                grid=(2,),
                in_specs=[
                    pl.BlockSpec((8, 128), lambda i: (i, 0)),
                    pl.BlockSpec((8, 128), lambda i: (0, 0),
                                 pipeline_mode=pl.Buffered(1)),
                ],
                out_specs=pl.BlockSpec((8, 128), lambda i: (i, 0)),
            ),
        )
        x = jnp.zeros((16, 128), jnp.float32)
        w = jnp.ones((8, 128), jnp.float32)
        jax.block_until_ready(probe(x, w))
        return True
    except Exception:
        return False


# ---------------------------------------------------------------------------
# Kernels
# ---------------------------------------------------------------------------

def _ffn_resident_kernel(x_ref, w1_ref, b1_ref, w2_ref, b2_ref, o_ref):
    # x_ref: (tm, dmp); w1_ref: (dmp, dfp); b1_ref: (1, dfp) f32;
    # w2_ref: (dfp, dmp); b2_ref: (1, dmp) f32.
    h = jnp.dot(x_ref[...], w1_ref[...], preferred_element_type=jnp.float32)
    h = jnp.maximum(h + b1_ref[...], 0.0)          # bias + ReLU in f32
    # dropout: identity in inference mode
    h = h.astype(w2_ref.dtype)                     # keep MXU at native-dtype rate
    y = jnp.dot(h, w2_ref[...], preferred_element_type=jnp.float32)
    o_ref[...] = (y + b2_ref[...]).astype(o_ref.dtype)


def _ffn_sliced_kernel(x_ref, w1_ref, b1_ref, w2_ref, b2_ref, o_ref, acc_ref):
    # Grid: (rows "parallel", d_ff slices "arbitrary").  Weight slices stream;
    # x tile and f32 accumulator stay resident across the inner axis.
    f = pl.program_id(1)

    @pl.when(f == 0)
    def _():
        # Seed the accumulator with b2: the epilogue bias add becomes free.
        acc_ref[...] = jnp.broadcast_to(b2_ref[...], acc_ref.shape).astype(jnp.float32)

    h = jnp.dot(x_ref[...], w1_ref[...], preferred_element_type=jnp.float32)
    h = jnp.maximum(h + b1_ref[...], 0.0)          # bias + ReLU in f32
    # dropout: identity in inference mode
    h = h.astype(w2_ref.dtype)
    acc_ref[...] += jnp.dot(h, w2_ref[...], preferred_element_type=jnp.float32)

    @pl.when(f == pl.num_programs(1) - 1)
    def _():
        o_ref[...] = acc_ref[...].astype(o_ref.dtype)


# ---------------------------------------------------------------------------
# pallas_call builders (cached per static configuration)
# ---------------------------------------------------------------------------

@functools.lru_cache(maxsize=None)
def _build_resident(m_pad, dmp, dfp, tm, x_dtype_name, single_buffer, vmem_limit):
    x_dtype = jnp.dtype(x_dtype_name)
    w_kwargs = {"pipeline_mode": pl.Buffered(1)} if single_buffer else {}
    call = pl.pallas_call(
        _ffn_resident_kernel,
        out_shape=jax.ShapeDtypeStruct((m_pad, dmp), x_dtype),
        grid_spec=pltpu.PrefetchScalarGridSpec(
            num_scalar_prefetch=0,
            grid=(m_pad // tm,),
            in_specs=[
                pl.BlockSpec((tm, dmp), lambda i: (i, 0)),               # x rows
                pl.BlockSpec((dmp, dfp), lambda i: (0, 0), **w_kwargs),  # W1^T (resident)
                pl.BlockSpec((1, dfp), lambda i: (0, 0), **w_kwargs),    # b1 (f32)
                pl.BlockSpec((dfp, dmp), lambda i: (0, 0), **w_kwargs),  # W2^T (resident)
                pl.BlockSpec((1, dmp), lambda i: (0, 0), **w_kwargs),    # b2 (f32)
            ],
            out_specs=pl.BlockSpec((tm, dmp), lambda i: (i, 0)),
        ),
        compiler_params=pltpu.CompilerParams(
            dimension_semantics=("parallel",),
            vmem_limit_bytes=vmem_limit,
        ),
    )
    return jax.jit(call)


@functools.lru_cache(maxsize=None)
def _build_sliced(m_pad, dmp, dfp, tm, tf, x_dtype_name, vmem_limit):
    x_dtype = jnp.dtype(x_dtype_name)
    call = pl.pallas_call(
        _ffn_sliced_kernel,
        out_shape=jax.ShapeDtypeStruct((m_pad, dmp), x_dtype),
        grid_spec=pltpu.PrefetchScalarGridSpec(
            num_scalar_prefetch=0,
            grid=(m_pad // tm, dfp // tf),
            in_specs=[
                pl.BlockSpec((tm, dmp), lambda i, f: (i, 0)),   # x rows (resident over f)
                pl.BlockSpec((dmp, tf), lambda i, f: (0, f)),   # W1^T slice (streamed)
                pl.BlockSpec((1, tf), lambda i, f: (0, f)),     # b1 slice (f32)
                pl.BlockSpec((tf, dmp), lambda i, f: (f, 0)),   # W2^T slice (streamed)
                pl.BlockSpec((1, dmp), lambda i, f: (0, 0)),    # b2 (f32)
            ],
            out_specs=pl.BlockSpec((tm, dmp), lambda i, f: (i, 0)),
            scratch_shapes=[pltpu.VMEM((tm, dmp), jnp.float32)],
        ),
        compiler_params=pltpu.CompilerParams(
            dimension_semantics=("parallel", "arbitrary"),
            vmem_limit_bytes=vmem_limit,
        ),
    )
    return jax.jit(call)


# ---------------------------------------------------------------------------
# Parameter preparation (once per model) and per-call wrapper
# ---------------------------------------------------------------------------

class FFNParams(NamedTuple):
    w1p: jax.Array
    b1p: jax.Array
    w2p: jax.Array
    b2p: jax.Array
    d_model: int
    d_ff: int
    dmp: int
    dfp: int
    use_sliced: bool
    tf: int
    tm: int
    single_buffer: bool
    compute_dtype: str


def prepare_ffn_params(w1_t, b1, w2_t, b2, *, compute_dtype=None, tm=None,
                       force_sliced=False, tf=None):
    """Pad + cast weights once at setup time and plan the kernel path.

    Weights are stored (in_features, out_features) — the transpose of PyTorch's
    nn.Linear layout.  compute_dtype (e.g. jnp.bfloat16) casts weights (and x,
    per call) for full-rate MXU; accumulation / bias / ReLU stay f32.
    """
    d_model, d_ff = w1_t.shape
    assert w2_t.shape == (d_ff, d_model)
    w_dtype = jnp.dtype(compute_dtype) if compute_dtype is not None else jnp.dtype(w1_t.dtype)

    dmp = _round_up(d_model, 128)     # lane-dense feature dims
    dfp = _round_up(d_ff, 128)

    vmem_cap = _vmem_capacity_bytes()
    budget = max(vmem_cap - (8 << 20), 16 << 20)   # ~8 MiB headroom, per core

    single_buffer = _single_buffer_supported()
    n_wbuf = 1 if single_buffer else 2

    tm_plan = int(tm) if tm is not None else 256
    resident_bytes = (
        n_wbuf * 2 * dmp * dfp * w_dtype.itemsize   # W1^T and W2^T resident
        + n_wbuf * (dfp + dmp) * 4                  # f32 biases
        + 2 * 2 * tm_plan * dmp * 4                 # x + out tiles, double-buffered (f32 worst case)
        + tm_plan * dfp * 4                         # f32 intermediate h
        + tm_plan * dmp * 4                         # f32 second-dot result
    )
    use_sliced = bool(force_sliced) or (resident_bytes > 0.7 * budget)

    if use_sliced:
        if tm is None:
            tm_plan = 512          # re-streamed weights: larger row tile halves reloads
        if tf is None:
            tf_eff = min(512, dfp)
        else:
            tf_eff = min(_round_up(int(tf), 128), dfp)
        dfp = _round_up(dfp, tf_eff)
    else:
        tf_eff = dfp

    # One-time padding / casting (kept out of the per-call path).
    w1p = jnp.asarray(w1_t, w_dtype)
    if (dmp, dfp) != (d_model, d_ff):
        w1p = jnp.pad(w1p, ((0, dmp - d_model), (0, dfp - d_ff)))
    w2p = jnp.asarray(w2_t, w_dtype)
    if (dfp, dmp) != (d_ff, d_model):
        w2p = jnp.pad(w2p, ((0, dfp - d_ff), (0, dmp - d_model)))
    b1p = jnp.pad(jnp.asarray(b1, jnp.float32), (0, dfp - d_ff)).reshape(1, dfp)
    b2p = jnp.pad(jnp.asarray(b2, jnp.float32), (0, dmp - d_model)).reshape(1, dmp)

    return FFNParams(w1p, b1p, w2p, b2p, d_model, d_ff, dmp, dfp,
                     use_sliced, tf_eff, tm_plan, single_buffer, str(w_dtype))


def positionwise_feed_forward(params: FFNParams, x):
    """x: (..., d_model) -> (..., d_model) in the compute dtype."""
    d_model, dmp, dfp = params.d_model, params.dmp, params.dfp
    orig_shape = x.shape

    x2d = x.reshape(-1, d_model).astype(jnp.dtype(params.compute_dtype))
    M = x2d.shape[0]

    # Row tile: multiple of 16 covers f32 (8) and bf16 (16) sublane minimums.
    tm_eff = min(params.tm, _round_up(M, 16))
    m_pad = _round_up(M, tm_eff)

    if m_pad != M or dmp != d_model:
        x2d = jnp.pad(x2d, ((0, m_pad - M), (0, dmp - d_model)))

    budget_cap = max(_vmem_capacity_bytes() - (8 << 20), 16 << 20)
    x_it = jnp.dtype(x2d.dtype).itemsize
    w_it = jnp.dtype(params.w1p.dtype).itemsize

    if params.use_sliced:
        tf = params.tf
        needed = (
            2 * 2 * dmp * tf * w_it          # streamed W1/W2 slices, double-buffered
            + 2 * (tf + dmp) * 4             # bias slices
            + 2 * 2 * tm_eff * dmp * x_it    # x + out tiles
            + tm_eff * dmp * 4               # f32 accumulator scratch
            + tm_eff * tf * 4                # f32 intermediate h slice
            + tm_eff * dmp * 4               # f32 partial product
        )
        vmem_limit = min(int(needed * 1.5) + (4 << 20), budget_cap)
        call = _build_sliced(m_pad, dmp, dfp, tm_eff, tf, str(x2d.dtype), vmem_limit)
    else:
        n_wbuf = 1 if params.single_buffer else 2
        needed = (
            n_wbuf * 2 * dmp * dfp * w_it
            + n_wbuf * (dfp + dmp) * 4
            + 2 * 2 * tm_eff * dmp * x_it
            + tm_eff * dfp * 4
            + tm_eff * dmp * 4
        )
        vmem_limit = min(int(needed * 1.5) + (4 << 20), budget_cap)
        call = _build_resident(m_pad, dmp, dfp, tm_eff, str(x2d.dtype),
                               params.single_buffer, vmem_limit)

    out = call(x2d, params.w1p, params.b1p, params.w2p, params.b2p)
    out = out[:M, :d_model]
    return out.reshape(orig_shape)


def _reference(x, w1_t, b1, w2_t, b2):
    h = jnp.maximum(x @ w1_t + b1, 0.0)
    return h @ w2_t + b2


if __name__ == "__main__":
    key = jax.random.PRNGKey(0)
    # Small but lane-dense shapes (feature dims are multiples of 128).
    batch, seq, d_model, d_ff = 2, 8, 128, 256

    k_x, k_w1, k_b1, k_w2, k_b2 = jax.random.split(key, 5)
    x = jax.random.normal(k_x, (batch, seq, d_model), dtype=jnp.float32)

    # Deterministic init matching nn.Linear(d_model, d_ff) / nn.Linear(d_ff, d_model).
    # PyTorch stores weight as (out, in); we keep the transposed (in, out) layout.
    bound1 = 1.0 / float(d_model) ** 0.5
    bound2 = 1.0 / float(d_ff) ** 0.5
    w1_t = jax.random.uniform(k_w1, (d_model, d_ff), jnp.float32, -bound1, bound1)
    b1 = jax.random.uniform(k_b1, (d_ff,), jnp.float32, -bound1, bound1)
    w2_t = jax.random.uniform(k_w2, (d_ff, d_model), jnp.float32, -bound2, bound2)
    b2 = jax.random.uniform(k_b2, (d_model,), jnp.float32, -bound2, bound2)

    y_ref = _reference(x, w1_t, b1, w2_t, b2)

    # Path 1: resident-weight kernel (default for these small shapes).
    params = prepare_ffn_params(w1_t, b1, w2_t, b2)
    y = jax.block_until_ready(positionwise_feed_forward(params, x))
    assert y.shape == (batch, seq, d_model)
    assert jnp.allclose(y, y_ref, atol=1e-4, rtol=1e-4), "resident path mismatch"

    # Path 2: force the d_ff-sliced accumulator path (used for large d_ff / v7x),
    # with tf=128 so the inner grid axis actually iterates (2 slices).
    params_s = prepare_ffn_params(w1_t, b1, w2_t, b2, force_sliced=True, tf=128)
    y_s = jax.block_until_ready(positionwise_feed_forward(params_s, x))
    assert jnp.allclose(y_s, y_ref, atol=1e-4, rtol=1e-4), "sliced path mismatch"

    # Path 3: optional bf16 compute path (dtype-aware tolerance).
    params_bf = prepare_ffn_params(w1_t, b1, w2_t, b2, compute_dtype=jnp.bfloat16)
    y_bf = jax.block_until_ready(positionwise_feed_forward(params_bf, x))
    assert jnp.allclose(y_bf.astype(jnp.float32), y_ref, atol=5e-2, rtol=5e-2), \
        "bf16 path mismatch"

    print("KERNEL_OK")
</pallas_src>

<mosaic_0001>
module attributes {stable_mosaic.version = 11 : i64} {
  func.func @k(%arg0: i32, %arg1: memref<8x128xf32, #tpu.memory_space<vmem>>, %arg2: memref<8x128xf32, #tpu.memory_space<vmem>>, %arg3: memref<8x128xf32, #tpu.memory_space<vmem>>) attributes {dimension_semantics = [#tpu.dimension_semantics<arbitrary>], iteration_bounds = array<i64: 2>, scalar_prefetch = 0 : i64, scratch_operands = 0 : i64, tpu.core_type = #tpu.core_type<tc>, window_params = [{transform_indices = @transform_0, window_bounds = array<i64: 8, 128>}, {pipeline_mode = #tpu.pipeline_mode<synchronous>, transform_indices = @transform_1, window_bounds = array<i64: 8, 128>}, {transform_indices = @transform_2, window_bounds = array<i64: 8, 128>}]} {
    %c0 = arith.constant 0 : index
    %c0_0 = arith.constant 0 : index
    %0 = vector.load %arg1[%c0, %c0_0] : memref<8x128xf32, #tpu.memory_space<vmem>>, vector<8x128xf32>
    %c0_1 = arith.constant 0 : index
    %c0_2 = arith.constant 0 : index
    %1 = vector.load %arg2[%c0_1, %c0_2] : memref<8x128xf32, #tpu.memory_space<vmem>>, vector<8x128xf32>
    %2 = arith.addf %0, %1 : vector<8x128xf32>
    %c0_3 = arith.constant 0 : index
    %c0_4 = arith.constant 0 : index
    %3 = vector.load %arg3[%c0_3, %c0_4] : memref<8x128xf32, #tpu.memory_space<vmem>>, vector<8x128xf32>
    tpu.vector_store %arg3[%c0_3, %c0_4], %2 {strides = array<i32>} : memref<8x128xf32, #tpu.memory_space<vmem>>, vector<8x128xf32>,
    return
  }
  func.func @transform_0(%arg0: i32) -> (i32, i32) {
    %c0_i32 = arith.constant 0 : i32
    %c0_i32_0 = arith.constant 0 : i32
    return %arg0, %c0_i32 : i32, i32
  }
  func.func @transform_1(%arg0: i32) -> (i32, i32) {
    %c0_i32 = arith.constant 0 : i32
    %c0_i32_0 = arith.constant 0 : i32
    %c0_i32_1 = arith.constant 0 : i32
    return %c0_i32, %c0_i32_0 : i32, i32
  }
  func.func @transform_2(%arg0: i32) -> (i32, i32) {
    %c0_i32 = arith.constant 0 : i32
    %c0_i32_0 = arith.constant 0 : i32
    return %arg0, %c0_i32 : i32, i32
  }
}

module attributes {stable_mosaic.version = 11 : i64} {
  func.func @_ffn_resident_kernel(%arg0: i32, %arg1: memref<16x128xf32, #tpu.memory_space<vmem>>, %arg2: memref<128x256xf32, #tpu.memory_space<vmem>>, %arg3: memref<1x256xf32, #tpu.memory_space<vmem>>, %arg4: memref<256x128xf32, #tpu.memory_space<vmem>>, %arg5: memref<1x128xf32, #tpu.memory_space<vmem>>, %arg6: memref<16x128xf32, #tpu.memory_space<vmem>>) attributes {dimension_semantics = [#tpu.dimension_semantics<parallel>], iteration_bounds = array<i64: 1>, scalar_prefetch = 0 : i64, scratch_operands = 0 : i64, tpu.core_type = #tpu.core_type<tc>, window_params = [{transform_indices = @transform_0, window_bounds = array<i64: 16, 128>}, {pipeline_mode = #tpu.pipeline_mode<synchronous>, transform_indices = @transform_1, window_bounds = array<i64: 128, 256>}, {pipeline_mode = #tpu.pipeline_mode<synchronous>, transform_indices = @transform_2, window_bounds = array<i64: 1, 256>}, {pipeline_mode = #tpu.pipeline_mode<synchronous>, transform_indices = @transform_3, window_bounds = array<i64: 256, 128>}, {pipeline_mode = #tpu.pipeline_mode<synchronous>, transform_indices = @transform_4, window_bounds = array<i64: 1, 128>}, {transform_indices = @transform_5, window_bounds = array<i64: 16, 128>}]} {
    %c0 = arith.constant 0 : index
    %c0_0 = arith.constant 0 : index
    %0 = vector.load %arg1[%c0, %c0_0] : memref<16x128xf32, #tpu.memory_space<vmem>>, vector<16x128xf32>
    %c0_1 = arith.constant 0 : index
    %c0_2 = arith.constant 0 : index
    %1 = vector.load %arg2[%c0_1, %c0_2] : memref<128x256xf32, #tpu.memory_space<vmem>>, vector<128x256xf32>
    %cst = arith.constant dense<0.000000e+00> : vector<16x256xf32>
    %2 = tpu.matmul %0, %1, %cst {dimension_numbers = #tpu.dot_dimension_numbers<[1], [0], [0], [1], [0, 0, 1, 1], [], []>} : vector<16x128xf32>, vector<128x256xf32>, vector<16x256xf32> -> vector<16x256xf32>
    %c0_3 = arith.constant 0 : index
    %c0_4 = arith.constant 0 : index
    %3 = vector.load %arg3[%c0_3, %c0_4] : memref<1x256xf32, #tpu.memory_space<vmem>>, vector<1x256xf32>
    %4 = vector.broadcast %3 : vector<1x256xf32> to vector<16x256xf32>
    %5 = arith.addf %2, %4 : vector<16x256xf32>
    %cst_5 = arith.constant 0.000000e+00 : f32
    %6 = vector.broadcast %cst_5 : f32 to vector<16x256xf32>
    %7 = arith.maximumf %5, %6 : vector<16x256xf32>
    %c0_6 = arith.constant 0 : index
    %c0_7 = arith.constant 0 : index
    %8 = vector.load %arg4[%c0_6, %c0_7] : memref<256x128xf32, #tpu.memory_space<vmem>>, vector<256x128xf32>
    %cst_8 = arith.constant dense<0.000000e+00> : vector<16x128xf32>
    %9 = tpu.matmul %7, %8, %cst_8 {dimension_numbers = #tpu.dot_dimension_numbers<[1], [0], [0], [1], [0, 0, 1, 1], [], []>} : vector<16x256xf32>, vector<256x128xf32>, vector<16x128xf32> -> vector<16x128xf32>
    %c0_9 = arith.constant 0 : index
    %c0_10 = arith.constant 0 : index
    %10 = vector.load %arg5[%c0_9, %c0_10] : memref<1x128xf32, #tpu.memory_space<vmem>>, vector<1x128xf32>
    %11 = vector.broadcast %10 : vector<1x128xf32> to vector<16x128xf32>
    %12 = arith.addf %9, %11 : vector<16x128xf32>
    %c0_11 = arith.constant 0 : index
    %c0_12 = arith.constant 0 : index
    %13 = vector.load %arg6[%c0_11, %c0_12] : memref<16x128xf32, #tpu.memory_space<vmem>>, vector<16x128xf32>
    tpu.vector_store %arg6[%c0_11, %c0_12], %12 {strides = array<i32>} : memref<16x128xf32, #tpu.memory_space<vmem>>, vector<16x128xf32>,
    return
  }
  func.func @transform_0(%arg0: i32) -> (i32, i32) {
    %c0_i32 = arith.constant 0 : i32
    %c0_i32_0 = arith.constant 0 : i32
    return %arg0, %c0_i32 : i32, i32
  }
  func.func @transform_1(%arg0: i32) -> (i32, i32) {
    %c0_i32 = arith.constant 0 : i32
    %c0_i32_0 = arith.constant 0 : i32
    %c0_i32_1 = arith.constant 0 : i32
    return %c0_i32, %c0_i32_0 : i32, i32
  }
  func.func @transform_2(%arg0: i32) -> (i32, i32) {
    %c0_i32 = arith.constant 0 : i32
    %c0_i32_0 = arith.constant 0 : i32
    %c0_i32_1 = arith.constant 0 : i32
    return %c0_i32, %c0_i32_0 : i32, i32
  }
  func.func @transform_3(%arg0: i32) -> (i32, i32) {
    %c0_i32 = arith.constant 0 : i32
    %c0_i32_0 = arith.constant 0 : i32
    %c0_i32_1 = arith.constant 0 : i32
    return %c0_i32, %c0_i32_0 : i32, i32
  }
  func.func @transform_4(%arg0: i32) -> (i32, i32) {
    %c0_i32 = arith.constant 0 : i32
    %c0_i32_0 = arith.constant 0 : i32
    %c0_i32_1 = arith.constant 0 : i32
    return %c0_i32, %c0_i32_0 : i32, i32
  }
  func.func @transform_5(%arg0: i32) -> (i32, i32) {
    %c0_i32 = arith.constant 0 : i32
    %c0_i32_0 = arith.constant 0 : i32
    return %arg0, %c0_i32 : i32, i32
  }
}

</mosaic_0001>

<bundles_post_ra>
// kernel: tpu_custom_call.1
= control target key start
LH: loop header
LB: loop body
LE: loop exit
PB: predicated region body
PF: predicated region fallthrough
CT: control target
= control target key end

     0   :  { %7 = vsyncpa [#allocation3], 0  ;;  %s633_s0 = inlined_call_operand.hbm [shape: f32[16,128], index: 0, kind: input, shape index: {}]   ;;  %s634_s1 = inlined_call_operand.hbm [shape: f32[8,128], index: 1, kind: input, shape index: {}]   ;;  %s635_s2 = inlined_call_operand.hbm [shape: f32[16,128], index: 2, kind: output, shape index: {}]  }
   0x1   :  { %9 = vsyncpa [#allocation3 + $0x1], 0 }
   0x2   :  { %10 = vsyncpa [#allocation6], 0 }
   0x3   :  { %11 = vsyncpa [#allocation4], 0 }
   0x4   :  { %13 = vsyncpa [#allocation4 + $0x1], 0  ;;  %s495_s9 = smov 0   ;;  %s497_s10 = smov 0  }
   0x5   :  { %s499_s11 = smov 0   ;;  %s501_s12 = smov 0  }
   0x6 LB: > { %s516_s13 = sadd.s32 4294967295, %s477_s12   ;;  %s276_s14 = sadd.s32 4294967294, %s477_s12   ;;  %s477_s12 = sphi %s501_s12, %s645_s12   ;;  %s473_s11 = sphi %s499_s11, %s644_s11   ;;  %s469_s10 = sphi %s497_s10, %s643_s10   ;;  %s465_s9 = sphi %s495_s9, %s642_s9  }
   0x7   : > { %p39_p0 = scmp.ne.s32.totalorder %s469_s10, %s465_s9  ;;  %p40_p1 = scmp.eq.s32.totalorder %s516_s13, 0 }
   0x8   : > { %p84_p2 = scmp.eq.s32.totalorder %s516_s13, 1  ;;  %p90_p3 = scmp.eq.s32.totalorder %s276_s14, 1 }
   0x9   : > { %p525_p4 = por %p40_p1, %p39_p0  ;;  %p277_p5 = scmp.ge.s32.totalorder %s477_s12, 1 }
   0xa   : > { %p530_p6 = por %p90_p3, %p39_p0  ;;  %p97_p7 = scmp.lt.s32.totalorder %s477_s12, 3 }
   0xb   : > { %s109_s19 = sshll.u32 %s634_s1, 4  ;;  %s479_s21 = smov [#allocation5]   ;;  %s110_s19 = int_to_ptr.hbm [resolvable:$true] %s109_s19 }
   0xc   : > { %p538_p8 = pnand %p277_p5, %p97_p7  ;;  %s111_s22 = sshll.u32 %s479_s21, 4  ;;  %s112_s22 = int_to_ptr.vmem [resolvable:$true] %s111_s22 }
   0xd   : > { %s548_s23 = sadd.s32 1, %s477_s12   ;;  %s26_s24 = sadd.s32 1, %s473_s11 }
   0xe   : > { %p298_p10 = pneg %p538_p8  ;;  %s23_s25 = ssub.s32 %s477_s12, %s548_s23 }
   0xf   : > { %p24_p12 = scmp.eq.s32.totalorder %s23_s25, 0  ;;  %p33_p13 = scmp.ne.s32.totalorder %s473_s11, %s469_s10 }
  0x10   : > { %p299_p11 = pnand %p298_p10, %p40_p1  ;;  %p34_p0 = scmp.eq.s32.totalorder %s477_s12, 0 }
  0x11   : > { %s557_s26 = scalar_select %p24_p12, %s473_s11, %s26_s24  }
  0x12   : > { %301 = dma.hbm_to_vmem [thread:$0]  (!%p299_p11), %s110_s19, 128, %s112_s22, [#allocation6]  }
  0x13   : > { %p561_p3 = por %p84_p2, %p33_p13  ;;  %p311_p5 = scmp.lt.s32.totalorder %s477_s12, 2 }
  0x14   : > { %s122_s28 = sand.u32 1, %s473_s11   ;;  %s281_s29 = sshll.u32 %s477_s12, 3 }
  0x15   : > { %p35_p7 = por %p34_p0, %p33_p13  ;;  %s280_s30 = sshll.u32 %s122_s28, 3 }
  0x16   : > { %s130_s5 = scalar_lea.hbm %s633_s0, %s281_s29  ;;  %s126_s7 = scalar_lea.vmem [#allocation2], %s280_s30 }
  0x17   : > { %s132_s6 = sshll.u32 %s130_s5, 4  ;;  %s134_s8 = sshll.u32 %s126_s7, 4  ;;  %s133_s6 = int_to_ptr.hbm [resolvable:$true] %s132_s6  ;;  %s135_s8 = int_to_ptr.vmem [resolvable:$true] %s134_s8 }
  0x18   : > { %p571_p10 = pnand %p311_p5, %p35_p7  ;;  %s123_s17 = scalar_lea.sflag [#allocation3], %s122_s28 }
  0x19   : > { %s377_s18 = sshra.s32 %s133_s6, 4  ;;  %s384_s24 = scalar_lea.hbm %s633_s0, 16  ;;  %s378_s18 = int_to_ptr.hbm [resolvable:$true] %s377_s18 }
  0x1a   : > { %s379_s19 = scalar_lea.hbm %s378_s18, 8  ;;  %p381_p11 = pneg %p571_p10 }
  0x1b   : > { %p380_p2 = scmp.ne.s32.totalorder %s378_s18, %s379_s19  ;;  %p385_p0 = scmp.lt.s32.totalorder %s378_s18, %s633_s0 }
  0x1c   : > { %p386_p5 = scmp.lt.s32.totalorder %s384_s24, %s379_s19 }
  0x1d   : > { %p382_p12 = pnand %p381_p11, %p380_p2 }
  0x1e   : > { %p387_p7 = por %p386_p5, %p385_p0 }
  0x1f   : > { %p383_p13 = pneg %p382_p12 }
  0x21   : > { %p388_p9 = pnand %p387_p7, %p383_p13 }
  0x23   : > { %391 = shalt.err (!%p388_p9)
}
  0x24   : > { %305 = dma.hbm_to_vmem [thread:$0]  (!%p571_p10), %s133_s6, 128, %s135_s8, %s123_s17  }
  0x25   : > { %143 = sbr.rel (%p538_p8) target bundleno = 60 (0x3c), region = 28  ;;  %s588_s28 = sand.u32 (!%p538_p8), 1, %s469_s10  }
  0x26   : > { %s283_s30 = sshll.u32 (!%p538_p8), %s588_s28, 3  ;;  %s146_s3 = scalar_lea.sflag (!%p538_p8), [#allocation3], %s588_s28 }
  0x27   : > { %s149_s4 = scalar_lea.vmem (!%p538_p8), [#allocation2], %s283_s30 }
  0x2a   : > { %452 = dma.done.wait (%p525_p4), %s146_s3, 128  }
  0x2b   : > { %454 = vsyncadd (%p525_p4), %s146_s3, 4294967168 }
  0x2c   : > { %456 = dma.done.wait (%p40_p1), [#allocation6], 128  }
  0x2d   : > { %458 = vsyncadd (%p40_p1), [#allocation6], 4294967168  ;;  %s287_s20 = sshll.u32 %s516_s13, 3  ;;  %s175_s8 = scalar_lea.vmem [#allocation7], %s283_s30  ;;  %v176_v0 = vld [vmem:[%s149_s4] sm:$0xff]  ;;  %v177_v1 = vld [vmem:[#allocation5] sm:$0xff] }
  0x2e   : > { %s191_s7 = scalar_lea.hbm %s635_s2, %s287_s20  ;;  %s193_s14 = sshll.u32 %s175_s8, 4  ;;  %v178_v2 = vadd.f32 %v177_v1, %v176_v0  ;;  %s194_s14 = int_to_ptr.vmem [resolvable:$true] %s193_s14 }
  0x2f   : > { %s195_s17 = sshll.u32 %s191_s7, 4  ;;  %s181_s15 = scalar_lea.sflag [#allocation4], %s588_s28  ;;  %s196_s17 = int_to_ptr.hbm [resolvable:$true] %s195_s17 }
  0x30   : > { %179 = vst [vmem:[%s175_s8] sm:$0xff] %v178_v2  ;;  %s421_s18 = sshra.s32 %s196_s17, 4  ;;  %s427_s22 = scalar_lea.hbm %s635_s2, 16  ;;  %s422_s18 = int_to_ptr.hbm [resolvable:$true] %s421_s18 }
  0x31   : > { %s423_s19 = scalar_lea.hbm %s422_s18, 8  ;;  %p428_p9 = scmp.lt.s32.totalorder %s422_s18, %s635_s2 }
  0x32   : > { %p424_p1 = scmp.ne.s32.totalorder %s422_s18, %s423_s19  ;;  %p429_p10 = scmp.lt.s32.totalorder %s427_s22, %s423_s19 }
  0x34   : > { %p425_p4 = pnand %p424_p1, %p561_p3  ;;  %p430_p2 = por %p429_p10, %p428_p9 }
  0x36   : > { %p426_p8 = pneg %p425_p4 }
  0x38   : > { %p431_p11 = pnand %p430_p2, %p426_p8 }
  0x3a   : > { %434 = shalt.err (!%p431_p11)
}
  0x3b   : > { %296 = dma.vmem_to_hbm [thread:$0]  (%p561_p3), %s194_s14, 128, %s196_s17, %s181_s15  }
  0x3c PF: > { %s207_s29 = sand.u32 1, %s465_s9   ;;  %p641_p12 = scmp.ge.s32.totalorder %s477_s12, 2 }
  0x3d   : > { %s208_s28 = scalar_lea.sflag [#allocation4], %s207_s29 }
  0x3e   : > { %p307_p13 = pnand %p641_p12, %p530_p6 }
  0x40   : > { %p308_p0 = pneg %p307_p13 }
  0x42   : > { %460 = dma.done.wait (%p308_p0), %s208_s28, 128  }
  0x43   : > { %462 = vsyncadd (%p308_p0), %s208_s28, 4294967168  ;;  %p16_p5 = scmp.ge.s32.totalorder %s548_s23, 4   ;;  %s642_s9 = smov %s469_s10 }
  0x44   : > { %s643_s10 = smov %s473_s11  ;;  %s644_s11 = smov %s557_s26 }
  0x45   : > { %s645_s12 = smov %s548_s23  ;;  %18 = sbr.rel (!%p16_p5) target bundleno = 6 (0x6), region = 77 }
  0x4a   :  { %214 = vsyncpa [#allocation3], 1 }
  0x4b   :  { %216 = vsyncpa [#allocation3 + $0x1], 1 }
  0x4c   :  { %217 = vsyncpa [#allocation6], 1 }
  0x4d   :  { %218 = vsyncpa [#allocation4], 1 }
  0x4e   :  { %220 = vsyncpa [#allocation4 + $0x1], 1 }

// kernel: tpu_custom_call.1
= control target key start
LH: loop header
LB: loop body
LE: loop exit
PB: predicated region body
PF: predicated region fallthrough
CT: control target
= control target key end

     0   :  { %10 = vsyncpa [#allocation3], 0  ;;  %s481_s0 = inlined_call_operand.hbm [shape: f32[16,128], index: 0, kind: input, shape index: {}]   ;;  %s482_s1 = inlined_call_operand.hbm [shape: f32[128,256], index: 1, kind: input, shape index: {}]   ;;  %s483_s2 = inlined_call_operand.hbm [shape: f32[1,256], index: 2, kind: input, shape index: {}]   ;;  %s484_s3 = inlined_call_operand.hbm [shape: f32[256,128], index: 3, kind: input, shape index: {}]   ;;  %s485_s4 = inlined_call_operand.vmem [shape: f32[1,128], index: 4, kind: input, shape index: {}]   ;;  %s486_s5 = inlined_call_operand.hbm [shape: f32[16,128], index: 5, kind: output, shape index: {}]  }
   0x1   :  { %11 = vsyncpa [#allocation6], 0 }
   0x2   :  { %12 = vsyncpa [#allocation9], 0  ;;  %s31_s20 = sshll.u32 %s482_s1, 4  ;;  %s32_s20 = int_to_ptr.hbm [resolvable:$true] %s31_s20 }
   0x3   :  { %13 = vsyncpa [#allocation4], 0  ;;  %s415_s21 = smov [#allocation5]   ;;  %s18_s25 = sshll.u32 %s481_s0, 4  ;;  %s19_s25 = int_to_ptr.hbm [resolvable:$true] %s18_s25 }
   0x4   :  { %s33_s22 = sshll.u32 %s415_s21, 4  ;;  %s416_s26 = smov 256   ;;  %s34_s22 = int_to_ptr.vmem [resolvable:$true] %s33_s22 }
   0x5   :  { %s417_s27 = smov 16   ;;  %s418_s28 = smov [#allocation2]  }
   0x6   :  { %39 = dma.hbm_to_vmem [thread:$0]  %s32_s20, 4096, %s34_s22, [#allocation6], %s416_s26, %s416_s26, %s417_s27  }
   0x7   :  { %s20_s29 = sshll.u32 %s418_s28, 4  ;;  %s419_s30 = smov 128   ;;  %s21_s29 = int_to_ptr.vmem [resolvable:$true] %s20_s29 }
   0x8   :  { %s420_s6 = smov 8   ;;  %s45_s8 = sshll.u32 %s483_s2, 4  ;;  %s46_s8 = int_to_ptr.hbm [resolvable:$true] %s45_s8 }
   0x9   :  { %26 = dma.hbm_to_vmem [thread:$0]  %s19_s25, 256, %s21_s29, [#allocation3], %s419_s30, %s419_s30, %s420_s6  }
   0xa   :  { %s421_s9 = smov [#allocation7]   ;;  %s55_s12 = sshll.u32 %s484_s3, 4  ;;  %s56_s12 = int_to_ptr.hbm [resolvable:$true] %s55_s12 }
   0xb   :  { %s47_s0 = sshll.u32 %s421_s9, 4  ;;  %s422_s13 = smov [#allocation8]   ;;  %s48_s0 = int_to_ptr.vmem [resolvable:$true] %s47_s0 }
   0xc   :  { %50 = dma.hbm_to_vmem [thread:$0]  %s46_s8, 32, %s48_s0, [#allocation6]  }
   0xd   :  { %s57_s14 = sshll.u32 %s422_s13, 4  ;;  %s58_s14 = int_to_ptr.vmem [resolvable:$true] %s57_s14 }
   0xe   :  { %63 = dma.hbm_to_vmem [thread:$0]  %s56_s12, 4096, %s58_s14, [#allocation9], %s419_s30, %s419_s30, %s420_s6  }
   0xf   :  { %407 = dma.done.wait [#allocation3], 256  }
  0x10   :  { %408 = vsyncadd [#allocation3], 4294967040 }
  0x11   :  { %409 = dma.done.wait [#allocation6], 4128  }
  0x12   :  { %410 = vsyncadd [#allocation6], 4294963168 }
  0x13   :  { %411 = dma.done.wait [#allocation9], 4096  }
  0x14   :  { %412 = vsyncadd [#allocation9], 4294963200  ;;  %v114_v0 = vld [vmem:[#allocation5 + $0xf0] sm:$0xff]  ;;  %v112_v1 = vld [vmem:[#allocation5 + $0xe0] sm:$0xff]  ;;  %s423_s15 = smov [#allocation10]   ;;  %s262_s19 = sshll.u32 %s486_s5, 4  ;;  %s263_s19 = int_to_ptr.hbm [resolvable:$true] %s262_s19 }
  0x15   :  { %v115_v2 = vld [vmem:[#allocation5 + $0xf8] sm:$0xff]  ;;  %122 = vmatpush.msra.mxu0 %v114_v0  ;;  %v113_v3 = vld [vmem:[#allocation5 + $0xe8] sm:$0xff]  ;;  %v110_v4 = vld [vmem:[#allocation5 + $0xd0] sm:$0xff]  ;;  %s260_s16 = sshll.u32 %s423_s15, 4  ;;  %s261_s16 = int_to_ptr.vmem [resolvable:$true] %s260_s16 }
  0x16   :  { %145 = vmatpush.msra.mxu1 %v115_v2  ;;  %v111_v5 = vld [vmem:[#allocation5 + $0xd8] sm:$0xff]  ;;  %v108_v6 = vld [vmem:[#allocation5 + $0xc0] sm:$0xff]  ;;  %v109_v7 = vld [vmem:[#allocation5 + $0xc8] sm:$0xff] }
  0x17   :  { %123 = vmatpush.msra.mxu0 %v112_v1  ;;  %v106_v8 = vld [vmem:[#allocation5 + $0xb0] sm:$0xff]  ;;  %v107_v9 = vld [vmem:[#allocation5 + $0xb8] sm:$0xff]  ;;  %v104_v10 = vld [vmem:[#allocation5 + $0xa0] sm:$0xff] }
  0x18   :  { %146 = vmatpush.msra.mxu1 %v113_v3  ;;  %v105_v11 = vld [vmem:[#allocation5 + $0xa8] sm:$0xff]  ;;  %v102_v12 = vld [vmem:[#allocation5 + $0x90] sm:$0xff]  ;;  %v103_v13 = vld [vmem:[#allocation5 + $0x98] sm:$0xff] }
  0x19   :  { %124 = vmatpush.msra.mxu0 %v110_v4  ;;  %v187_v14 = vld [vmem:[#allocation8 + $0x78] sm:$0xff]  ;;  %v186_v15 = vld [vmem:[#allocation8 + $0x70] sm:$0xff]  ;;  %v101_v17 = vld [vmem:[#allocation5 + $0x88] sm:$0xff] }
  0x1a   :  { %147 = vmatpush.msra.mxu1 %v111_v5  ;;  %v100_v16 = vld [vmem:[#allocation5 + $0x80] sm:$0xff]  ;;  %208 = vmatpush.msra.mxu2 %v187_v14  ;;  %v185_v19 = vld [vmem:[#allocation8 + $0x68] sm:$0xff]  ;;  %v202_v20 = vld [vmem:[#allocation8 + $0xf0] sm:$0xff] }
  0x1b   :  { %125 = vmatpush.msra.mxu0 %v108_v6  ;;  %v203_v18 = vld [vmem:[#allocation8 + $0xf8] sm:$0xff]  ;;  %v98_v21 = vld [vmem:[#allocation5 + $0x70] sm:$0xff]  ;;  %v184_v23 = vld [vmem:[#allocation8 + $0x60] sm:$0xff] }
  0x1c   :  { %148 = vmatpush.msra.mxu1 %v109_v7  ;;  %v99_v22 = vld [vmem:[#allocation5 + $0x78] sm:$0xff]  ;;  %209 = vmatpush.msra.mxu2 %v186_v15  ;;  %v201_v24 = vld [vmem:[#allocation8 + $0xe8] sm:$0xff]  ;;  %v96_v25 = vld [vmem:[#allocation5 + $0x60] sm:$0xff] }
  0x1d   :  { %126 = vmatpush.msra.mxu0 %v106_v8  ;;  %231 = vmatpush.msra.mxu3 %v203_v18  ;;  %v97_v26 = vld [vmem:[#allocation5 + $0x68] sm:$0xff]  ;;  %v183_v27 = vld [vmem:[#allocation8 + $0x58] sm:$0xff]  ;;  %v94_v29 = vld [vmem:[#allocation5 + $0x50] sm:$0xff] }
  0x1e   :  { %149 = vmatpush.msra.mxu1 %v107_v9  ;;  %210 = vmatpush.msra.mxu2 %v185_v19  ;;  %v200_v28 = vld [vmem:[#allocation8 + $0xe0] sm:$0xff]  ;;  %v95_v30 = vld [vmem:[#allocation5 + $0x58] sm:$0xff]  ;;  %v181_v35 = vld [vmem:[#allocation8 + $0x48] sm:$0xff] }
  0x1f   :  { %127 = vmatpush.msra.mxu0 %v104_v10  ;;  %232 = vmatpush.msra.mxu3 %v202_v20  ;;  %v182_v31 = vld [vmem:[#allocation8 + $0x50] sm:$0xff]  ;;  %v199_v32 = vld [vmem:[#allocation8 + $0xd8] sm:$0xff]  ;;  %v93_v34 = vld [vmem:[#allocation5 + $0x48] sm:$0xff] }
  0x20   :  { %150 = vmatpush.msra.mxu1 %v105_v11  ;;  %211 = vmatpush.msra.mxu2 %v184_v23  ;;  %v92_v33 = vld [vmem:[#allocation5 + $0x40] sm:$0xff]  ;;  %v198_v36 = vld [vmem:[#allocation8 + $0xd0] sm:$0xff]  ;;  %v197_v40 = vld [vmem:[#allocation8 + $0xc8] sm:$0xff] }
  0x21   :  { %128 = vmatpush.msra.mxu0 %v102_v12  ;;  %233 = vmatpush.msra.mxu3 %v201_v24  ;;  %v90_v37 = vld [vmem:[#allocation5 + $0x30] sm:$0xff]  ;;  %v91_v38 = vld [vmem:[#allocation5 + $0x38] sm:$0xff]  ;;  %v180_v39 = vld [vmem:[#allocation8 + $0x40] sm:$0xff] }
  0x22   :  { %151 = vmatpush.msra.mxu1 %v103_v13  ;;  %212 = vmatpush.msra.mxu2 %v183_v27  ;;  %v88_v41 = vld [vmem:[#allocation5 + $0x20] sm:$0xff]  ;;  %v89_v42 = vld [vmem:[#allocation5 + $0x28] sm:$0xff]  ;;  %v86_v45 = vld [vmem:[#allocation5 + $0x10] sm:$0xff] }
  0x23   :  { %129 = vmatpush.msra.mxu0 %v100_v16  ;;  %234 = vmatpush.msra.mxu3 %v200_v28  ;;  %v179_v43 = vld [vmem:[#allocation8 + $0x38] sm:$0xff]  ;;  %v196_v44 = vld [vmem:[#allocation8 + $0xc0] sm:$0xff]  ;;  %v178_v47 = vld [vmem:[#allocation8 + $0x30] sm:$0xff] }
  0x24   :  { %152 = vmatpush.msra.mxu1 %v101_v17  ;;  %213 = vmatpush.msra.mxu2 %v182_v31  ;;  %v87_v46 = vld [vmem:[#allocation5 + $0x18] sm:$0xff]  ;;  %v84_v49 = vld [vmem:[#allocation5] sm:$0xff]  ;;  %v85_v50 = vld [vmem:[#allocation5 + $0x8] sm:$0xff] }
  0x25   :  { %130 = vmatpush.msra.mxu0 %v98_v21  ;;  %235 = vmatpush.msra.mxu3 %v199_v32  ;;  %v195_v48 = vld [vmem:[#allocation8 + $0xb8] sm:$0xff]  ;;  %v82_v51 = vld [vmem:[#allocation2] sm:$0xff]  ;;  %v176_v54 = vld [vmem:[#allocation8 + $0x20] sm:$0xff] }
  0x26   :  { %153 = vmatpush.msra.mxu1 %v99_v22  ;;  %214 = vmatpush.msra.mxu2 %v181_v35  ;;  %v177_v52 = vld [vmem:[#allocation8 + $0x28] sm:$0xff]  ;;  %v194_v53 = vld [vmem:[#allocation8 + $0xb0] sm:$0xff]  ;;  %v175_v56 = vld [vmem:[#allocation8 + $0x18] sm:$0xff] }
  0x27   :  { %131 = vmatpush.msra.mxu0 %v96_v25  ;;  %236 = vmatpush.msra.mxu3 %v198_v36  ;;  %v193_v55 = vld [vmem:[#allocation8 + $0xa8] sm:$0xff]  ;;  %v192_v57 = vld [vmem:[#allocation8 + $0xa0] sm:$0xff]  ;;  %v83_v58 = vld [vmem:[#allocation2 + $0x8] sm:$0xff] }
  0x28   :  { %154 = vmatpush.msra.mxu1 %v97_v26  ;;  %215 = vmatpush.msra.mxu2 %v180_v39  ;;  %v174_v59 = vld [vmem:[#allocation8 + $0x10] sm:$0xff]  ;;  %v191_v60 = vld [vmem:[#allocation8 + $0x98] sm:$0xff]  ;;  %v173_v61 = vld [vmem:[#allocation8 + $0x8] sm:$0xff] }
  0x29   :  { %132 = vmatpush.msra.mxu0 %v94_v29  ;;  %237 = vmatpush.msra.mxu3 %v197_v40  ;;  %v190_v62 = vld [vmem:[#allocation8 + $0x90] sm:$0xff]  ;;  %v172_v63 = vld [vmem:[#allocation8] sm:$0xff]  ;;  %v189_v0 = vld [vmem:[#allocation8 + $0x88] sm:$0xff] }
  0x2a   :  { %155 = vmatpush.msra.mxu1 %v95_v30  ;;  %216 = vmatpush.msra.mxu2 %v179_v43  ;;  %v188_v1 = vld [vmem:[#allocation8 + $0x80] sm:$0xff]  ;;  %v116_v2 = vld [vmem:[#allocation7] sm:$0x3]  ;;  %v286_v17 = vld [vmem:[%s485_s4] ss:$0 sm:$0xff] }
  0x2b   :  { %133 = vmatpush.msra.mxu0 %v92_v33  ;;  %238 = vmatpush.msra.mxu3 %v196_v44  ;;  %v118_v3 = vperm.slane %v116_v2, 0  ;;  %v119_v4 = vperm.slane %v116_v2, 1 }
  0x2c   :  { %156 = vmatpush.msra.mxu1 %v93_v34  ;;  %217 = vmatpush.msra.mxu2 %v178_v47 }
  0x2d   :  { %134 = vmatpush.msra.mxu0 %v90_v37  ;;  %239 = vmatpush.msra.mxu3 %v195_v48 }
  0x2e   :  { %157 = vmatpush.msra.mxu1 %v91_v38  ;;  %218 = vmatpush.msra.mxu2 %v177_v52 }
  0x2f   :  { %135 = vmatpush.msra.mxu0 %v88_v41  ;;  %240 = vmatpush.msra.mxu3 %v194_v53 }
  0x30   :  { %158 = vmatpush.msra.mxu1 %v89_v42  ;;  %219 = vmatpush.msra.mxu2 %v176_v54 }
  0x31   :  { %136 = vmatpush.msra.mxu0 %v86_v45  ;;  %241 = vmatpush.msra.mxu3 %v193_v55 }
  0x32   :  { %159 = vmatpush.msra.mxu1 %v87_v46  ;;  %220 = vmatpush.msra.mxu2 %v175_v56 }
  0x33   :  { %137 = vmatpush.msra.mxu0 %v84_v49  ;;  %242 = vmatpush.msra.mxu3 %v192_v57 }
  0x34   :  { %160 = vmatpush.msra.mxu1 %v85_v50  ;;  %138 = vmatmul.f32.vlgmr.msra.gmra.mxu0 %v82_v51 }
  0x35   :  { %161 = vmatmul.f32.vlgmr.msra.gmra.mxu1 %v82_v51  ;;  %221 = vmatpush.msra.mxu2 %v174_v59 }
  0x36   :  { %243 = vmatpush.msra.mxu3 %v191_v60 }
  0x37   :  { %222 = vmatpush.msra.mxu2 %v173_v61 }
  0x38   :  { %244 = vmatpush.msra.mxu3 %v190_v62 }
  0x39   :  { %223 = vmatpush.msra.mxu2 %v172_v63 }
  0x3a   :  { %245 = vmatpush.msra.mxu3 %v189_v0 }
  0x3c   :  { %141 = vmatmul.f32.gmra.mxu0 %v83_v58  ;;  %246 = vmatpush.msra.mxu3 %v188_v1 }
  0x3d   :  { %164 = vmatmul.f32.gmra.mxu1 %v83_v58 }
  0xb1   :  { %v139_v5 = vpop.f32.mrf.mxu0 }
  0xb2   :  { %v162_v6 = vpop.f32.mrf.mxu1  ;;  %v140_v7 = vadd.f32 %v139_v5, %v118_v3 }
  0xb3   :  { %v163_v8 = vadd.f32 %v162_v6, %v119_v4 }
  0xb4   :  { %v168_v9 = vmax.f32 %v140_v7, 0.0 }
  0xb5   :  { %v169_v10 = vmax.f32 %v163_v8, 0.0 }
  0xb6   :  { %224 = vmatmul.f32.vlgmr.msra.gmra.mxu2 %v168_v9 }
  0xb7   :  { %247 = vmatmul.f32.vlgmr.msra.gmra.mxu3 %v169_v10 }
  0xb9   :  { %v142_v11 = vpop.f32.mrf.mxu0 }
  0xba   :  { %v165_v12 = vpop.f32.mrf.mxu1  ;;  %v143_v13 = vadd.f32 %v142_v11, %v118_v3 }
  0xbb   :  { %v166_v14 = vadd.f32 %v165_v12, %v119_v4 }
  0xbc   :  { %v170_v15 = vmax.f32 %v143_v13, 0.0 }
  0xbd   :  { %v171_v16 = vmax.f32 %v166_v14, 0.0 }
  0xbe   :  { %227 = vmatmul.f32.gmra.mxu2 %v170_v15 }
  0xbf   :  { %250 = vmatmul.f32.gmra.mxu3 %v171_v16 }
 0x139   :  { %v225_v18 = vpop.f32.mrf.mxu2 }
 0x13a   :  { %v248_v19 = vpop.f32.mrf.mxu3  ;;  %v226_v20 = vadd.f32 %v286_v17, %v225_v18 }
 0x13c   :  { %v249_v21 = vadd.f32 %v248_v19, %v226_v20 }
 0x13e   :  { %254 = vst [vmem:[#allocation10] sm:$0xff] %v249_v21 }
 0x141   :  { %v228_v22 = vpop.f32.mrf.mxu2 }
 0x142   :  { %v251_v23 = vpop.f32.mrf.mxu3  ;;  %v229_v24 = vadd.f32 %v286_v17, %v228_v22 }
 0x144   :  { %v252_v25 = vadd.f32 %v251_v23, %v229_v24 }
 0x146   :  { %255 = vst [vmem:[#allocation10 + $0x8] sm:$0xff] %v252_v25 }
 0x147   :  { %268 = dma.vmem_to_hbm [thread:$0]  %s261_s16, 256, %s263_s19, [#allocation4], %s419_s30, %s419_s30, %s420_s6  }
 0x148   :  { %413 = dma.done.wait [#allocation4], 256  }
 0x149   :  { %414 = vsyncadd [#allocation4], 4294967040 }
 0x14a   :  { %273 = vsyncpa [#allocation3], 1 }
 0x14b   :  { %274 = vsyncpa [#allocation6], 1 }
 0x14c   :  { %275 = vsyncpa [#allocation9], 1 }
 0x14d   :  { %276 = vsyncpa [#allocation4], 1 }

</bundles_post_ra>
